<compile_context>
chip_gen: v7x
topology: tpu7x:2x2x1
jax: 0.10.0
libtpu: 0.0.40
codegen_flags: <defaults>
</compile_context>

<pallas_src>
import jax
import jax.numpy as jnp
from jax import lax
from jax.experimental import pallas as pl
from jax.experimental.pallas import tpu as pltpu


_LANE = 128
_SUBLANE = 8
_MAX_IDS_PER_CALL = 32768        # bounds pow2-padded SMEM for scalar-prefetch ids


def _vmem_capacity_bytes() -> int:
    try:
        return int(pltpu.get_tpu_info().vmem_capacity_bytes)
    except Exception:
        return 64 * 1024 * 1024  # conservative: v7x per-core VMEM


def _round_up(x: int, m: int) -> int:
    return (x + m - 1) // m * m


def _pick_block_rows(n: int, h_dim_pad: int, itemsize: int) -> int:
    if n >= 8192:
        b = 512
    elif n >= 2048:
        b = 256
    elif n >= 256:
        b = 128
    elif n >= 64:
        b = 64
    else:
        b = 8
    # Keep one (double-buffered) output block to a few MiB.
    while b > 8 and b * h_dim_pad * itemsize > (4 << 20):
        b //= 2
    return b


# ----------------------------------------------------------------------------
# Path A1 ("onehot"): small table resident in VMEM; gather = one-hot @ table
# on the MXU.  No serial scalar loop at all.
# ----------------------------------------------------------------------------
def _gather_onehot_kernel(ids_ref, table_ref, out_ref):
    ids = ids_ref[...]                                        # (b, 1) int32
    b = ids.shape[0]
    num_nodes = table_ref.shape[0]
    cols = lax.broadcasted_iota(jnp.int32, (b, num_nodes), 1)
    onehot = jnp.where(ids == cols, 1.0, 0.0).astype(table_ref.dtype)
    out_ref[...] = jnp.dot(
        onehot, table_ref[...], preferred_element_type=jnp.float32
    ).astype(out_ref.dtype)


# ----------------------------------------------------------------------------
# Path A2 ("slice"): table resident in VMEM; 8 rows loaded per inner step and
# written back with ONE aligned (8, h_dim) store.
# ----------------------------------------------------------------------------
def _gather_slice_kernel(ids_ref, table_ref, out_ref):
    i = pl.program_id(0)
    b = out_ref.shape[0]
    n8 = b // _SUBLANE

    def body8(j8, carry):
        base = i * b + j8 * _SUBLANE
        rows = [table_ref[pl.ds(ids_ref[base + k], 1), :]
                for k in range(_SUBLANE)]
        tile = jnp.concatenate(rows, axis=0)                  # (8, h_dim)
        start = pl.multiple_of(j8 * _SUBLANE, _SUBLANE)
        out_ref[pl.ds(start, _SUBLANE), :] = tile
        return carry

    lax.fori_loop(0, n8, body8, 0, unroll=min(8, n8))


# ----------------------------------------------------------------------------
# Path B ("hbm"): table stays in HBM; B per-row DMAs per step land directly in
# the pipelined output block, all signalling one DMA semaphore; one combined
# wait covers the whole block (DMA semaphores count bytes).
# ----------------------------------------------------------------------------
def _gather_hbm_kernel(ids_ref, table_hbm, out_ref, sem_ref):
    i = pl.program_id(0)
    b = out_ref.shape[0]

    def issue(j, carry):
        row = ids_ref[i * b + j]
        pltpu.make_async_copy(
            table_hbm.at[pl.ds(row, 1), :],
            out_ref.at[pl.ds(j, 1), :],
            sem_ref,
        ).start()
        return carry

    lax.fori_loop(0, b, issue, 0, unroll=8)
    # Single wait for all b row copies (size = full output block).
    pltpu.make_async_copy(out_ref, out_ref, sem_ref).wait()


# ----------------------------------------------------------------------------
# Wrapper
# ----------------------------------------------------------------------------
def embedding_lookup(table: jax.Array, ids: jax.Array, *, mode: str = "auto"
                     ) -> jax.Array:
    """Pallas TPU equivalent of nn.Embedding(table)(ids) for integer ids.

    mode: "auto" | "onehot" | "slice" | "hbm"
    """
    num_nodes, h_dim = table.shape
    ids = jnp.atleast_1d(jnp.asarray(ids)).astype(jnp.int32).reshape(-1)
    n = int(ids.shape[0])
    if n == 0:
        return jnp.zeros((0, h_dim), table.dtype)

    # TODO(synk): PyTorch nn.Embedding raises on out-of-range ids; an OOB DMA on
    # TPU is a hard device fault, so we clamp instead (silently remaps bad ids).
    ids = jnp.clip(ids, 0, num_nodes - 1)

    # Lane-dense output blocks: pad the hidden dim to a multiple of 128.
    h_dim_pad = _round_up(h_dim, _LANE)
    if h_dim_pad != h_dim:
        table = jnp.pad(table, ((0, 0), (0, h_dim_pad - h_dim)))

    dtype = table.dtype
    itemsize = jnp.dtype(dtype).itemsize
    table_bytes = num_nodes * h_dim_pad * itemsize
    cap = _vmem_capacity_bytes()

    b = _pick_block_rows(n, h_dim_pad, itemsize)
    table_fits = (table_bytes + 2 * b * h_dim_pad * itemsize + (2 << 20)
                  <= int(0.85 * cap))

    if mode == "auto":
        mode = ("onehot" if num_nodes <= 1024 else "slice") if table_fits else "hbm"
    elif mode in ("onehot", "slice") and not table_fits:
        mode = "hbm"
    if mode not in ("onehot", "slice", "hbm"):
        raise ValueError(f"unknown mode {mode!r}")

    if mode == "onehot":
        # Keep the (b, num_nodes) one-hot operand modest to avoid vreg spills.
        while b > 8 and b * num_nodes * 4 > (1 << 20):
            b //= 2

    out_block_bytes = b * h_dim_pad * itemsize
    resident_need = table_bytes + 2 * out_block_bytes + (2 << 20)
    vmem_cap = cap - (1 << 20)
    vmem_limit_resident = int(min(vmem_cap, max(32 << 20, resident_need + (8 << 20))))
    vmem_limit_hbm = int(min(vmem_cap, max(32 << 20, 4 * out_block_bytes + (8 << 20))))

    def run_onehot(ids_pad):
        n_pad = ids_pad.shape[0]
        return pl.pallas_call(
            _gather_onehot_kernel,
            out_shape=jax.ShapeDtypeStruct((n_pad, h_dim_pad), dtype),
            grid=(n_pad // b,),
            in_specs=[
                pl.BlockSpec((b, 1), lambda i: (i, 0)),
                # Whole table resident in VMEM, single-buffered.
                pl.BlockSpec(memory_space=pltpu.MemorySpace.VMEM),
            ],
            out_specs=pl.BlockSpec((b, h_dim_pad), lambda i: (i, 0)),
            compiler_params=pltpu.CompilerParams(
                dimension_semantics=("parallel",),
                vmem_limit_bytes=vmem_limit_resident),
            cost_estimate=pl.CostEstimate(
                flops=2 * n_pad * num_nodes * h_dim_pad, transcendentals=0,
                bytes_accessed=table_bytes + n_pad * h_dim_pad * itemsize),
        )(ids_pad.reshape(n_pad, 1), table)

    def run_slice(ids_pad):
        n_pad = ids_pad.shape[0]
        return pl.pallas_call(
            _gather_slice_kernel,
            out_shape=jax.ShapeDtypeStruct((n_pad, h_dim_pad), dtype),
            grid_spec=pltpu.PrefetchScalarGridSpec(
                num_scalar_prefetch=1,
                grid=(n_pad // b,),
                in_specs=[pl.BlockSpec(memory_space=pltpu.MemorySpace.VMEM)],
                out_specs=pl.BlockSpec((b, h_dim_pad), lambda i, ids_ref: (i, 0)),
            ),
            compiler_params=pltpu.CompilerParams(
                dimension_semantics=("parallel",),
                vmem_limit_bytes=vmem_limit_resident),
            cost_estimate=pl.CostEstimate(
                flops=0, transcendentals=0,
                bytes_accessed=table_bytes + n_pad * h_dim_pad * itemsize),
        )(ids_pad, table)

    def run_hbm(ids_pad):
        n_pad = ids_pad.shape[0]
        return pl.pallas_call(
            _gather_hbm_kernel,
            out_shape=jax.ShapeDtypeStruct((n_pad, h_dim_pad), dtype),
            grid_spec=pltpu.PrefetchScalarGridSpec(
                num_scalar_prefetch=1,
                grid=(n_pad // b,),
                in_specs=[pl.BlockSpec(memory_space=pl.ANY)],   # table stays in HBM
                out_specs=pl.BlockSpec((b, h_dim_pad), lambda i, ids_ref: (i, 0)),
                scratch_shapes=[pltpu.SemaphoreType.DMA],        # one sem per step
            ),
            compiler_params=pltpu.CompilerParams(
                dimension_semantics=("parallel",),
                vmem_limit_bytes=vmem_limit_hbm),
            cost_estimate=pl.CostEstimate(
                flops=0, transcendentals=0,
                bytes_accessed=2 * n_pad * h_dim_pad * itemsize),
        )(ids_pad, table)

    run = {"onehot": run_onehot, "slice": run_slice, "hbm": run_hbm}[mode]

    # Scalar-prefetched ids live in SMEM (pow2-padded) -> chunk graph-scale id
    # counts across calls.  The one-hot path streams ids through VMEM instead.
    chunk = n if mode == "onehot" else min(n, _MAX_IDS_PER_CALL)
    outs = []
    for s in range(0, n, chunk):
        ids_c = ids[s:s + chunk]
        nc = int(ids_c.shape[0])
        nc_pad = _round_up(nc, b)
        if nc_pad != nc:
            ids_c = jnp.concatenate([ids_c, jnp.zeros((nc_pad - nc,), jnp.int32)])
        outs.append(run(ids_c)[:nc])
    out = outs[0] if len(outs) == 1 else jnp.concatenate(outs, axis=0)
    return out[:, :h_dim] if h_dim_pad != h_dim else out


class EmbeddingLayerPallas:
    """Pallas mirror of the PyTorch EmbeddingLayer module."""

    def __init__(self, num_nodes: int, h_dim: int, key: jax.Array):
        # nn.Embedding default init: weight ~ N(0, 1), float32.
        self.entity_embedding = jax.random.normal(
            key, (num_nodes, h_dim), dtype=jnp.float32)

    def __call__(self, g, h, r, norm):
        del g, r, norm                    # unused by the reference forward pass
        ids = jnp.atleast_1d(jnp.squeeze(jnp.asarray(h)))
        return embedding_lookup(self.entity_embedding, ids)


if __name__ == "__main__":
    key = jax.random.PRNGKey(0)
    k_emb, k_idx = jax.random.split(key)

    num_nodes, h_dim, n_query = 64, 128, 20   # n_query not a multiple of 8 -> pad/crop
    layer = EmbeddingLayerPallas(num_nodes, h_dim, k_emb)

    # h arrives with a trailing singleton dim (hence .squeeze() in the ref).
    h = jax.random.randint(k_idx, (n_query, 1), 0, num_nodes, dtype=jnp.int32)
    ids = jnp.squeeze(h)
    ref = jnp.take(layer.entity_embedding, ids, axis=0)

    # Default path (auto -> one-hot MXU gather for this small table).
    out = jax.block_until_ready(layer(None, h, None, None))
    assert out.shape == (n_query, h_dim)
    # MXU f32 matmul may use multi-pass bf16 decomposition -> small tolerance.
    assert jnp.allclose(out, ref, rtol=5e-3, atol=5e-3), "one-hot MXU gather mismatch"

    # Resident dynamic-slice path (used for larger VMEM-resident tables): exact.
    out_slice = jax.block_until_ready(
        embedding_lookup(layer.entity_embedding, ids, mode="slice"))
    assert jnp.array_equal(out_slice, ref), "resident slice gather mismatch"

    # HBM DMA-gather path (used for huge tables): exact.
    out_hbm = jax.block_until_ready(
        embedding_lookup(layer.entity_embedding, ids, mode="hbm"))
    assert jnp.array_equal(out_hbm, ref), "HBM DMA gather mismatch"

    print("KERNEL_OK")
</pallas_src>

<mosaic_0001>
module attributes {stable_mosaic.version = 11 : i64} {
  func.func @_gather_onehot_kernel(%arg0: i32, %arg1: memref<8x1xi32, #tpu.memory_space<vmem>>, %arg2: memref<64x128xf32, #tpu.memory_space<vmem>>, %arg3: memref<8x128xf32, #tpu.memory_space<vmem>>) attributes {dimension_semantics = [#tpu.dimension_semantics<parallel>], iteration_bounds = array<i64: 3>, scalar_prefetch = 0 : i64, scratch_operands = 0 : i64, tpu.core_type = #tpu.core_type<tc>, window_params = [{transform_indices = @transform_0, window_bounds = array<i64: 8, 1>}, {pipeline_mode = #tpu.pipeline_mode<synchronous>, transform_indices = @transform_1, window_bounds = array<i64: 64, 128>}, {transform_indices = @transform_2, window_bounds = array<i64: 8, 128>}]} {
    %c0 = arith.constant 0 : index
    %c0_0 = arith.constant 0 : index
    %0 = vector.load %arg1[%c0, %c0_0] : memref<8x1xi32, #tpu.memory_space<vmem>>, vector<8x1xi32>
    %1 = tpu.iota {dimensions = array<i32: 1>} : vector<8x64xi32>
    %2 = vector.broadcast %0 : vector<8x1xi32> to vector<8x64xi32>
    %3 = arith.cmpi eq, %2, %1 : vector<8x64xi32>
    %cst = arith.constant 1.000000e+00 : f32
    %cst_1 = arith.constant 0.000000e+00 : f32
    %4 = vector.broadcast %cst : f32 to vector<8x64xf32>
    %5 = vector.broadcast %cst_1 : f32 to vector<8x64xf32>
    %6 = arith.select %3, %4, %5 : vector<8x64xi1>, vector<8x64xf32>
    %c0_2 = arith.constant 0 : index
    %c0_3 = arith.constant 0 : index
    %7 = vector.load %arg2[%c0_2, %c0_3] : memref<64x128xf32, #tpu.memory_space<vmem>>, vector<64x128xf32>
    %cst_4 = arith.constant dense<0.000000e+00> : vector<8x128xf32>
    %8 = tpu.matmul %6, %7, %cst_4 {dimension_numbers = #tpu.dot_dimension_numbers<[1], [0], [0], [1], [0, 0, 1, 1], [], []>} : vector<8x64xf32>, vector<64x128xf32>, vector<8x128xf32> -> vector<8x128xf32>
    %c0_5 = arith.constant 0 : index
    %c0_6 = arith.constant 0 : index
    %9 = vector.load %arg3[%c0_5, %c0_6] : memref<8x128xf32, #tpu.memory_space<vmem>>, vector<8x128xf32>
    tpu.vector_store %arg3[%c0_5, %c0_6], %8 {strides = array<i32>} : memref<8x128xf32, #tpu.memory_space<vmem>>, vector<8x128xf32>,
    return
  }
  func.func @transform_0(%arg0: i32) -> (i32, i32) {
    %c0_i32 = arith.constant 0 : i32
    %c0_i32_0 = arith.constant 0 : i32
    return %arg0, %c0_i32 : i32, i32
  }
  func.func @transform_1(%arg0: i32) -> (i32, i32) {
    %c0_i32 = arith.constant 0 : i32
    %c0_i32_0 = arith.constant 0 : i32
    %c0_i32_1 = arith.constant 0 : i32
    return %c0_i32, %c0_i32_0 : i32, i32
  }
  func.func @transform_2(%arg0: i32) -> (i32, i32) {
    %c0_i32 = arith.constant 0 : i32
    %c0_i32_0 = arith.constant 0 : i32
    return %arg0, %c0_i32 : i32, i32
  }
}

</mosaic_0001>

<bundles_post_ra>
// kernel: tpu_custom_call.1
= control target key start
LH: loop header
LB: loop body
LE: loop exit
PB: predicated region body
PF: predicated region fallthrough
CT: control target
= control target key end

     0   :  { %7 = vsyncpa [#allocation3], 0  ;;  %s694_s0 = inlined_call_operand.vmem [shape: s32[24,1], index: 0, kind: input, shape index: {}]   ;;  %s695_s1 = inlined_call_operand.hbm [shape: f32[64,128], index: 1, kind: input, shape index: {}]   ;;  %s696_s2 = inlined_call_operand.hbm [shape: f32[24,128], index: 2, kind: output, shape index: {}]  }
   0x1   :  { %8 = vsyncpa [#allocation4], 0 }
   0x2   :  { %10 = vsyncpa [#allocation4 + $0x1], 0  ;;  %s559_s9 = smov 0   ;;  %s561_s10 = smov 0  }
   0x3   :  { %s563_s11 = smov 0   ;;  %s565_s12 = smov 0  }
   0x4 LB: > { %s580_s13 = sadd.s32 4294967295, %s534_s12   ;;  %s330_s14 = sadd.s32 4294967294, %s534_s12   ;;  %s534_s12 = sphi %s565_s12, %s712_s12   ;;  %s530_s11 = sphi %s563_s11, %s711_s11   ;;  %s526_s10 = sphi %s561_s10, %s710_s10   ;;  %s522_s9 = sphi %s559_s9, %s709_s9  }
   0x5   : > { %s584_s15 = sadd.s32 1, %s534_s12   ;;  %s70_s16 = sadd.s32 1, %s530_s11 }
   0x6   : > { %s67_s17 = ssub.s32 %s534_s12, %s584_s15  ;;  %p80_p0 = scmp.ne.s32.totalorder %s530_s11, %s526_s10 }
   0x7   : > { %p68_p1 = scmp.eq.s32.totalorder %s67_s17, 0  ;;  %p81_p2 = scmp.eq.s32.totalorder %s580_s13, 2 }
   0x8   : > { %p86_p3 = scmp.ne.s32.totalorder %s526_s10, %s522_s9  ;;  %p87_p4 = scmp.eq.s32.totalorder %s330_s14, 2 }
   0x9   : > { %s595_s18 = scalar_select %p68_p1, %s530_s11, %s70_s16  }
   0xa   : > { %p597_p5 = por %p81_p2, %p80_p0  ;;  %p601_p6 = por %p87_p4, %p86_p3 }
   0xb   : > { %p331_p7 = scmp.ge.s32.totalorder %s534_s12, 1  ;;  %p94_p8 = scmp.lt.s32.totalorder %s534_s12, 4 }
   0xc   : > { %s700_s19 = scalar_select %p597_p5, 1, 0 }
   0xd   : > { %s701_s20 = scalar_select %p601_p6, 1, 0 }
   0xe   : > { %p697_p9 = scmp.eq.s32.totalorder %s580_s13, 0  ;;  %p608_p10 = pnand %p331_p7, %p94_p8 }
   0xf   : > { %s536_s22 = smov [#allocation2]   ;;  %s440_s27 = scalar_lea.hbm %s695_s1, 1024 }
  0x10   : > { %s702_s21 = scalar_select %p608_p10, 1, 0 }
  0x11   : > { %s106_s23 = sshll.u32 %s536_s22, 4  ;;  %p389_p11 = pneg %p608_p10  ;;  %s107_s23 = int_to_ptr.vmem [resolvable:$true] %s106_s23 }
  0x12   : > { %p441_p13 = scmp.ne.s32.totalorder %s695_s1, %s440_s27  ;;  %p447_p3 = scmp.lt.u32.totalorder %s440_s27, %s695_s1 }
  0x13   : > { %p616_p12 = pnand %p697_p9, %p389_p11 }
  0x15   : > { %p442_p0 = pneg %p616_p12 }
  0x17   : > { %p443_p1 = pnand %p442_p0, %p441_p13 }
  0x19   : > { %p444_p2 = pneg %p443_p1 }
  0x1b   : > { %p449_p4 = pnand %p447_p3, %p444_p2 }
  0x1d   : > { %452 = shalt.err (!%p449_p4)
}
  0x1e   : > { %s453_s4 = scalar_lea.vmem %s107_s23, 1024  ;;  %p461_p9 = scmp.lt.s32.totalorder %s107_s23, %s107_s23 }
  0x1f   : > { %p454_p7 = scmp.ne.s32.totalorder %s107_s23, %s453_s4  ;;  %p462_p6 = scmp.lt.s32.totalorder %s453_s4, %s453_s4 }
  0x21   : > { %p456_p8 = pnand %p454_p7, %p442_p0  ;;  %p463_p5 = por %p462_p6, %p461_p9 }
  0x23   : > { %p457_p11 = pneg %p456_p8 }
  0x25   : > { %p464_p10 = pnand %p463_p5, %p457_p11 }
  0x27   : > { %467 = shalt.err (!%p464_p10)
}
  0x28   : > { %s537_s5 = smov 128   ;;  %s538_s6 = smov 8  }
  0x29   : > { %392 = dma.hbm_to_vmem [thread:$0]  (!%p616_p12), %s695_s1, 1024, %s107_s23, [#allocation3], %s537_s5, %s537_s5, %s538_s6  }
  0x2a   : > { %p704_p13 = scmp.ne.s32.totalorder %s702_s21, 0 }
  0x2b   : > { %p705_p1 = scmp.eq.s32.totalorder (!%p704_p13), %s580_s13, 0 }
  0x2c   : > { %129 = sbr.rel (%p704_p13) target bundleno = 415 (0x19f), region = 28 }
  0x33   : > { %513 = dma.done.wait (%p705_p1), [#allocation3], 1024   ;;  %p706_p0 = pmov %p705_p1 }
  0x34   : > { %p150_p5 = scmp.lt.s32.totalorder %s580_s13, 2  ;;  %v539_v0 = vmov 0   ;;  %v540_v1 = vmov 0.0|0.0   ;;  %v162_v3 = vld [vmem:[#allocation2] sm:$0xff]  ;;  %v163_v4 = vld [vmem:[#allocation2 + $0x8] sm:$0xff]  ;;  %v164_v6 = vld [vmem:[#allocation2 + $0x10] sm:$0xff]  ;;  %v155_v16 = vlaneseq }
  0x35   : > { %515 = vsyncadd (%p706_p0), [#allocation3], 4294966272  ;;  %439 = vset.pattern.permute.xlu0 %v539_v0  ;;  %371 = vmatprep.subr.bf16.mxu0 %v540_v1  ;;  %v372_v5 = vpack.c.bf16 %v163_v4, %v162_v3  ;;  %v165_v7 = vld [vmem:[#allocation2 + $0x18] sm:$0xff]  ;;  %vm541_vm0 = vmmov 0   ;;  %v542_v8 = vmov 0.0   ;;  %v166_v10 = vld [vmem:[#allocation2 + $0x20] sm:$0xff] }
  0x36   : > { %s151_s14 = scalar_select %p150_p5, %s580_s13, 2  ;;  %368 = vmatprep.mubr.msk.f32.mxu0 %vm541_vm0, %v542_v8  ;;  %v375_v9 = vpack.c.bf16 %v165_v7, %v164_v6  ;;  %v167_v11 = vld [vmem:[#allocation2 + $0x28] sm:$0xff]  ;;  %v168_v13 = vld [vmem:[#allocation2 + $0x30] sm:$0xff]  ;;  %v169_v14 = vld [vmem:[#allocation2 + $0x38] sm:$0xff]  ;;  %v156_v17 = vand.u32 127, %v155_v16  ;;  %vm170_vm1 = vcmask 523264  }
  0x37   : > { %373 = vmatpush3.bf16.msra.mxu0 %v372_v5  ;;  %v378_v12 = vpack.c.bf16 %v167_v11, %v166_v10  ;;  %v381_v15 = vpack.c.bf16 %v169_v14, %v168_v13  ;;  %s147_s23 = sand.u32 1, %s526_s10   ;;  %s340_s27 = sshll.u32 %s580_s13, 7 }
  0x38   : > { %s337_s16 = sshll.u32 %s151_s14, 3  ;;  %374 = vmatprep.subr.bf16.mxu0 %v540_v1  ;;  %s336_s24 = sshll.u32 %s147_s23, 3 }
  0x39   : > { %s153_s21 = scalar_lea.vmem %s694_s0, %s337_s16  ;;  %s149_s25 = scalar_lea.vmem [#allocation5], %s336_s24 }
  0x3a   : > { %v154_v2 = vld [vmem:[%s153_s21] sm:$0xff]  ;;  %s259_s26 = sshll.u32 %s149_s25, 4  ;;  %s654_s30 = scalar_lea.hbm %s696_s2, %s340_s27  ;;  %s649_s26 = int_to_ptr.vmem [resolvable:$true] %s259_s26 }
  0x3b   : > { %158 = vperm.xlu0 %439, %v154_v2   ;;  %376 = vmatpush3.bf16.msra.mxu0 %v375_v9  ;;  %s246_s3 = scalar_lea.sflag [#allocation4], %s147_s23  ;;  %s468_s4 = scalar_lea.vmem %s649_s26, 128 }
  0x3c   : > { %377 = vmatprep.subr.bf16.mxu0 %v540_v1  ;;  %p469_p6 = scmp.ne.s32.totalorder %s649_s26, %s468_s4  ;;  %p707_p9 = scmp.ne.s32.totalorder %s700_s19, 0 }
  0x3d   : > { %s543_s13 = smov [#allocation5]  }
  0x3e   : > { %p470_p10 = pnand %p469_p6, %p707_p9  ;;  %s472_s5 = sshll.u32 %s543_s13, 4  ;;  %s473_s5 = int_to_ptr.vmem [resolvable:$false] %s472_s5 }
  0x3f   : > { %379 = vmatpush3.bf16.msra.mxu0 %v378_v12  ;;  %s474_s6 = scalar_lea.vmem %s473_s5, 256  ;;  %p475_p2 = scmp.lt.s32.totalorder %s649_s26, %s473_s5 }
  0x40   : > { %380 = vmatprep.subr.bf16.mxu0 %v540_v1  ;;  %p471_p12 = pneg %p470_p10  ;;  %p476_p3 = scmp.lt.s32.totalorder %s474_s6, %s468_s4 }
  0x42   : > { %p477_p4 = por %p476_p3, %p475_p2 }
  0x43   : > { %382 = vmatpush3.bf16.msra.mxu0 %v381_v15 }
  0x44   : > { %p478_p7 = pnand %p477_p4, %p471_p12 }
  0xba   : > { %v159_v18 = vpop.permute.xlu0 %158 }
  0xbb   : > { %vm160_vm2 = vcmp.eq.s32.totalorder %v159_v18, %v156_v17 }
  0xbc   : > { %v161_v19 = vsel %vm160_vm2, 1.0, %v542_v8 }
  0xbd   : > { %369 = vmatmul.mubr.msk.f32.vlgmr.msra.gmra.mrb[0].mxu0 %vm170_vm1, %v161_v19 }
 0x190   : > { %v240_v20 = vpop.f32.mrb[0].mxu0 }
 0x191   : > { %244 = vst [vmem:[%s149_s25] sm:$0xff] %v240_v20  ;;  %v370_v21 = vpop.f32.mrb[1].mxu0 }
 0x192   : > { %481 = shalt.err (!%p478_p7)
}
 0x193   : > { %s482_s7 = scalar_lea.hbm %s654_s30, 128  ;;  %s486_s16 = scalar_lea.hbm %s696_s2, 384 }
 0x194   : > { %p483_p8 = scmp.ne.s32.totalorder %s654_s30, %s482_s7  ;;  %p487_p1 = scmp.lt.u32.totalorder %s654_s30, %s696_s2 }
 0x195   : > { %p488_p0 = scmp.lt.u32.totalorder %s486_s16, %s482_s7  ;;  %p490_p6 = scmp.lt.u32.totalorder %s482_s7, %s654_s30 }
 0x196   : > { %p484_p11 = pnand %p483_p8, %p707_p9 }
 0x197   : > { %p489_p5 = por %p488_p0, %p487_p1 }
 0x198   : > { %p485_p13 = pneg %p484_p11 }
 0x199   : > { %p491_p10 = por %p490_p6, %p489_p5 }
 0x19b   : > { %p492_p12 = pnand %p491_p10, %p485_p13 }
 0x19d   : > { %495 = shalt.err (!%p492_p12)
}
 0x19e   : > { %387 = dma.vmem_to_hbm [thread:$0]  (%p707_p9), %s649_s26, 128, %s654_s30, %s246_s3  }
 0x19f PF: > { %p399_p2 = scmp.ge.s32.totalorder %s534_s12, 2  ;;  %s271_s21 = sand.u32 1, %s522_s9  }
 0x1a0   : > { %p708_p3 = scmp.ne.s32.totalorder %s701_s20, 0  ;;  %s272_s23 = scalar_lea.sflag [#allocation4], %s271_s21 }
 0x1a2   : > { %p394_p4 = pnand %p399_p2, %p708_p3 }
 0x1a4   : > { %517 = dma.done.wait (!%p394_p4), %s272_s23, 128  }
 0x1a5   : > { %519 = vsyncadd (!%p394_p4), %s272_s23, 4294967168  ;;  %p13_p7 = scmp.ge.s32.totalorder %s584_s15, 5   ;;  %s709_s9 = smov %s526_s10 }
 0x1a6   : > { %s710_s10 = smov %s530_s11  ;;  %s711_s11 = smov %s595_s18 }
 0x1a7   : > { %s712_s12 = smov %s584_s15  ;;  %15 = sbr.rel (!%p13_p7) target bundleno = 4 (0x4), region = 68 }
 0x1ae   :  { %277 = vsyncpa [#allocation3], 1 }
 0x1af   :  { %279 = vsyncpa [#allocation3 + $0x1], 1 }
 0x1b0   :  { %280 = vsyncpa [#allocation4], 1 }
 0x1b1   :  { %282 = vsyncpa [#allocation4 + $0x1], 1 }

</bundles_post_ra>
